<compile_context>
chip_gen: v7x
topology: tpu7x:2x2x1
jax: 0.10.0
libtpu: 0.0.40
codegen_flags: <defaults>
</compile_context>

<pallas_src>
import jax
import jax.numpy as jnp
from jax.experimental import pallas as pl
from jax.experimental.pallas import tpu as pltpu


_LANE = 128


def mlp_kernel(x_ref, mw_ref, w1_ref, b1_ref, b2_ref, o_ref):
    # x_ref:  (bt*F, E)  flattened rows of the batch tile (streamed)
    # mw_ref: (bt*F, 1)  per-row scale = mask[b, f] * w2[f]   (streamed)
    # w1_ref: (E, O)     linear1 weight, pre-transposed        (resident)
    # b1_ref: (1, O)     linear1 bias                          (resident)
    # b2_ref: (1,)       linear2 bias, SMEM scalar
    # o_ref:  (bt, O)
    r = x_ref.shape[0]
    bt, o_dim = o_ref.shape
    f = r // bt

    # linear1 over the whole row block: one MXU matmul with f32 accumulation.
    h = jnp.dot(x_ref[...], w1_ref[...], preferred_element_type=jnp.float32)
    h = jnp.maximum(h + b1_ref[...], 0.0)          # bias + ReLU (VPU)
    # TODO(synk): training-mode dropout (PRNG masking + 1/(1-p) scale) not
    # implemented in-kernel; inference-mode dropout is identity.

    # mask * transpose * linear2 collapse into a per-row scale + F-reduction:
    #   out[b, o] = sum_f w2[f] * mask[b, f] * h[b*F + f, o] + b2
    h = h * mw_ref[...]                            # lane-splat of a column, VPU
    out = jnp.sum(h.reshape(bt, f, o_dim), axis=1)  # sublane-group reduce (XLU)
    o_ref[...] = (out + b2_ref[0]).astype(o_ref.dtype)


def _pad_lanes(n):
    return ((n + _LANE - 1) // _LANE) * _LANE


def _vmem_capacity_bytes():
    """Generation-aware VMEM capacity; conservative fallback (v7x = 64 MiB)."""
    try:
        info = pltpu.get_tpu_info()
        cap = getattr(info, "vmem_capacity_bytes", None)
        if cap:
            return int(cap)
    except Exception:
        pass
    return 64 * 1024 * 1024


def _pick_batch_tile(B, F, E, O, dtype_bytes=4):
    """Pick a batch-tile size.

    Constraints:
      * big enough to amortize the ~0.35us per-grid-step overhead,
      * small enough that the grid has >= ~8 steps for large B (keeps the
        software pipeline streaming and lets v7x shard across its 2 TCs),
      * padded + double-buffered tiles fit a conservative VMEM budget.
    """
    # Padded VMEM bytes per batch element (minor dim padded to 128 lanes).
    x_b = F * _pad_lanes(E) * dtype_bytes           # x rows (streamed)
    mw_b = F * _pad_lanes(1) * dtype_bytes          # scale column (streamed)
    o_b = _pad_lanes(O) * dtype_bytes               # output rows (streamed)
    h_b = 3 * F * _pad_lanes(O) * 4                 # f32 compute temporaries
    per_elem = 2 * (x_b + mw_b + o_b) + h_b         # 2x = double buffering

    budget = min(_vmem_capacity_bytes() // 4, 16 * 1024 * 1024)
    bt = max(1, budget // per_elem)

    # Never collapse to a single grid step for non-trivial B: target >= ~8
    # steps so DMA/compute/writeback overlap and both v7x cores get work.
    if B >= 16:
        bt = min(bt, max(8, B // 8))
    bt = min(bt, 512, B)
    if bt >= 8:
        bt = (bt // 8) * 8
    return max(1, bt)


def mlp_forward(x, mask, w1, b1, w2, b2, bt=None):
    """x: (B, F, E) f32, mask: (B, F) f32 -> squeeze((B, O))."""
    B, F, E = x.shape
    O = w1.shape[0]

    if bt is None:
        bt = _pick_batch_tile(B, F, E, O)
    bt = max(1, min(bt, B))

    # Glue (cheap XLA ops): flatten x, fold mask*w2 into one per-row scale
    # column, present parameters in kernel-friendly layouts.
    x2d = x.reshape(B * F, E)                        # (B*F, E) contiguous rows
    mw = (mask * w2.reshape(1, F)).reshape(B * F, 1)  # (B*F, 1) per-row scale
    w1_t = w1.T                                      # (E, O)
    b1_r = b1.reshape(1, O)
    b2_r = b2.reshape(1,)                            # scalar -> SMEM

    grid = (pl.cdiv(B, bt),)
    vmem_limit = int(min(_vmem_capacity_bytes() // 2, 64 * 1024 * 1024))
    cost = pl.CostEstimate(
        flops=2 * B * F * E * O + 2 * B * F * O,
        transcendentals=0,
        bytes_accessed=4 * (B * F * E + B * F + E * O + O + B * O),
    )

    out = pl.pallas_call(
        mlp_kernel,
        out_shape=jax.ShapeDtypeStruct((B, O), x.dtype),
        grid_spec=pltpu.PrefetchScalarGridSpec(
            num_scalar_prefetch=0,
            grid=grid,
            in_specs=[
                pl.BlockSpec((bt * F, E), lambda i: (i, 0)),        # x rows (streamed)
                pl.BlockSpec((bt * F, 1), lambda i: (i, 0)),        # mask*w2 (streamed)
                pl.BlockSpec((E, O), lambda i: (0, 0)),             # W1^T (resident)
                pl.BlockSpec((1, O), lambda i: (0, 0)),             # b1 (resident)
                pl.BlockSpec(memory_space=pltpu.MemorySpace.SMEM),  # b2 scalar
            ],
            out_specs=pl.BlockSpec((bt, O), lambda i: (i, 0)),
        ),
        compiler_params=pltpu.CompilerParams(
            dimension_semantics=("parallel",),
            vmem_limit_bytes=vmem_limit,
        ),
        cost_estimate=cost,
    )(x2d, mw, w1_t, b1_r, b2_r)

    # torch.squeeze drops all singleton dims; (B, O) already has the trailing
    # singleton removed, so squeezing the remaining dims matches exactly.
    return jnp.squeeze(out)


def _reference(x, mask, w1, b1, w2, b2):
    h = jnp.einsum("bfe,oe->bfo", x, w1) + b1             # linear1
    h = jnp.maximum(h, 0.0)                               # relu (dropout=identity)
    h = h * mask[..., None]                               # mask
    y = jnp.einsum("bfo,f->bo", h, w2[0]) + b2[0]         # transpose + linear2
    return jnp.squeeze(y)


def _make_inputs(key, B, F, E, O):
    kx, km, k1, k2, k3, k4 = jax.random.split(key, 6)
    x = jax.random.normal(kx, (B, F, E), dtype=jnp.float32)
    mask = (jax.random.uniform(km, (B, F)) > 0.3).astype(jnp.float32)
    # deterministic parameter init (shapes per nn.Linear in __init__)
    w1 = jax.random.normal(k1, (O, E), dtype=jnp.float32) * 0.1   # linear1.weight
    b1 = jax.random.normal(k2, (O,), dtype=jnp.float32) * 0.1     # linear1.bias
    w2 = jax.random.normal(k3, (1, F), dtype=jnp.float32) * 0.1   # linear2.weight
    b2 = jax.random.normal(k4, (1,), dtype=jnp.float32) * 0.1     # linear2.bias
    return x, mask, w1, b1, w2, b2


if __name__ == "__main__":
    key = jax.random.PRNGKey(0)
    k_a, k_b, k_c = jax.random.split(key, 3)

    F, E, O = 8, 32, 16   # n_feature, n_embedding, n_out

    # Test 1: small batch, single grid step (whole batch in one tile).
    B = 2
    x, mask, w1, b1, w2, b2 = _make_inputs(k_a, B, F, E, O)
    out = jax.block_until_ready(mlp_forward(x, mask, w1, b1, w2, b2))
    ref = _reference(x, mask, w1, b1, w2, b2)
    assert out.shape == (B, O), out.shape
    assert jnp.allclose(out, ref, atol=1e-5, rtol=1e-5), "mismatch vs reference (test 1)"

    # Test 2: larger batch -> batch-tiled multi-step grid (bt=8, grid=6).
    B2 = 48
    x, mask, w1, b1, w2, b2 = _make_inputs(k_b, B2, F, E, O)
    out2 = jax.block_until_ready(mlp_forward(x, mask, w1, b1, w2, b2))
    ref2 = _reference(x, mask, w1, b1, w2, b2)
    assert out2.shape == (B2, O), out2.shape
    assert jnp.allclose(out2, ref2, atol=1e-5, rtol=1e-5), "mismatch vs reference (test 2)"

    # Test 3: ragged last tile (B not divisible by bt) exercises masked writes.
    B3 = 50
    x, mask, w1, b1, w2, b2 = _make_inputs(k_c, B3, F, E, O)
    out3 = jax.block_until_ready(mlp_forward(x, mask, w1, b1, w2, b2, bt=16))
    ref3 = _reference(x, mask, w1, b1, w2, b2)
    assert out3.shape == (B3, O), out3.shape
    assert jnp.allclose(out3, ref3, atol=1e-5, rtol=1e-5), "mismatch vs reference (test 3)"

    print("KERNEL_OK")
</pallas_src>

<mosaic_0001>
module attributes {stable_mosaic.version = 11 : i64} {
  func.func @mlp_kernel(%arg0: i32, %arg1: memref<16x32xf32, #tpu.memory_space<vmem>>, %arg2: memref<16x1xf32, #tpu.memory_space<vmem>>, %arg3: memref<32x16xf32, #tpu.memory_space<vmem>>, %arg4: memref<1x16xf32, #tpu.memory_space<vmem>>, %arg5: memref<1xf32, #tpu.memory_space<smem>>, %arg6: memref<2x16xf32, #tpu.memory_space<vmem>>) attributes {dimension_semantics = [#tpu.dimension_semantics<parallel>], iteration_bounds = array<i64: 1>, scalar_prefetch = 0 : i64, scratch_operands = 0 : i64, tpu.core_type = #tpu.core_type<tc>, window_params = [{transform_indices = @transform_0, window_bounds = array<i64: 16, 32>}, {transform_indices = @transform_1, window_bounds = array<i64: 16, 1>}, {pipeline_mode = #tpu.pipeline_mode<synchronous>, transform_indices = @transform_2, window_bounds = array<i64: 32, 16>}, {pipeline_mode = #tpu.pipeline_mode<synchronous>, transform_indices = @transform_3, window_bounds = array<i64: 1, 16>}, {transform_indices = @transform_4, window_bounds = array<i64: 1>}, {transform_indices = @transform_5, window_bounds = array<i64: 2, 16>}]} {
    %c0 = arith.constant 0 : index
    %c0_0 = arith.constant 0 : index
    %0 = vector.load %arg1[%c0, %c0_0] : memref<16x32xf32, #tpu.memory_space<vmem>>, vector<16x32xf32>
    %c0_1 = arith.constant 0 : index
    %c0_2 = arith.constant 0 : index
    %1 = vector.load %arg3[%c0_1, %c0_2] : memref<32x16xf32, #tpu.memory_space<vmem>>, vector<32x16xf32>
    %cst = arith.constant dense<0.000000e+00> : vector<16x16xf32>
    %2 = tpu.matmul %0, %1, %cst {dimension_numbers = #tpu.dot_dimension_numbers<[1], [0], [0], [1], [0, 0, 1, 1], [], []>} : vector<16x32xf32>, vector<32x16xf32>, vector<16x16xf32> -> vector<16x16xf32>
    %c0_3 = arith.constant 0 : index
    %c0_4 = arith.constant 0 : index
    %3 = vector.load %arg4[%c0_3, %c0_4] : memref<1x16xf32, #tpu.memory_space<vmem>>, vector<1x16xf32>
    %4 = vector.broadcast %3 : vector<1x16xf32> to vector<16x16xf32>
    %5 = arith.addf %2, %4 : vector<16x16xf32>
    %cst_5 = arith.constant 0.000000e+00 : f32
    %6 = vector.broadcast %cst_5 : f32 to vector<16x16xf32>
    %7 = arith.maximumf %5, %6 : vector<16x16xf32>
    %c0_6 = arith.constant 0 : index
    %c0_7 = arith.constant 0 : index
    %8 = vector.load %arg2[%c0_6, %c0_7] : memref<16x1xf32, #tpu.memory_space<vmem>>, vector<16x1xf32>
    %9 = vector.broadcast %8 : vector<16x1xf32> to vector<16x16xf32>
    %10 = arith.mulf %7, %9 : vector<16x16xf32>
    %11 = vector.shape_cast %10 : vector<16x16xf32> to vector<2x8x16xf32>
    %cst_8 = arith.constant dense<0.000000e+00> : vector<2x16xf32>
    %12 = vector.multi_reduction <add>, %11, %cst_8 [1] : vector<2x8x16xf32> to vector<2x16xf32>
    %c0_9 = arith.constant 0 : index
    %13 = memref.load %arg5[%c0_9] : memref<1xf32, #tpu.memory_space<smem>>
    %14 = vector.broadcast %13 : f32 to vector<2x16xf32>
    %15 = arith.addf %12, %14 : vector<2x16xf32>
    %c0_10 = arith.constant 0 : index
    %c0_11 = arith.constant 0 : index
    %16 = vector.load %arg6[%c0_10, %c0_11] : memref<2x16xf32, #tpu.memory_space<vmem>>, vector<2x16xf32>
    tpu.vector_store %arg6[%c0_10, %c0_11], %15 {strides = array<i32>} : memref<2x16xf32, #tpu.memory_space<vmem>>, vector<2x16xf32>,
    return
  }
  func.func @transform_0(%arg0: i32) -> (i32, i32) {
    %c0_i32 = arith.constant 0 : i32
    %c0_i32_0 = arith.constant 0 : i32
    return %arg0, %c0_i32 : i32, i32
  }
  func.func @transform_1(%arg0: i32) -> (i32, i32) {
    %c0_i32 = arith.constant 0 : i32
    %c0_i32_0 = arith.constant 0 : i32
    return %arg0, %c0_i32 : i32, i32
  }
  func.func @transform_2(%arg0: i32) -> (i32, i32) {
    %c0_i32 = arith.constant 0 : i32
    %c0_i32_0 = arith.constant 0 : i32
    %c0_i32_1 = arith.constant 0 : i32
    return %c0_i32, %c0_i32_0 : i32, i32
  }
  func.func @transform_3(%arg0: i32) -> (i32, i32) {
    %c0_i32 = arith.constant 0 : i32
    %c0_i32_0 = arith.constant 0 : i32
    %c0_i32_1 = arith.constant 0 : i32
    return %c0_i32, %c0_i32_0 : i32, i32
  }
  func.func @transform_4(%arg0: i32) -> i32 {
    %c0_i32 = arith.constant 0 : i32
    %c0_i32_0 = arith.constant 0 : i32
    return %c0_i32 : i32
  }
  func.func @transform_5(%arg0: i32) -> (i32, i32) {
    %c0_i32 = arith.constant 0 : i32
    %c0_i32_0 = arith.constant 0 : i32
    return %arg0, %c0_i32 : i32, i32
  }
}

</mosaic_0001>

<bundles_post_ra>
// kernel: tpu_custom_call.1
= control target key start
LH: loop header
LB: loop body
LE: loop exit
PB: predicated region body
PF: predicated region fallthrough
CT: control target
= control target key end

     0   :  { %vm35_vm0 = vcmask 261120   ;;  %v228_v6 = vmov 0   ;;  %s304_s0 = inlined_call_operand.vmem [shape: f32[16,32], index: 0, kind: input, shape index: {}]   ;;  %s305_s1 = inlined_call_operand.vmem [shape: f32[16,1], index: 1, kind: input, shape index: {}]   ;;  %s306_s2 = inlined_call_operand.vmem [shape: f32[32,16], index: 2, kind: input, shape index: {}]   ;;  %s307_s3 = inlined_call_operand.vmem [shape: f32[1,16], index: 3, kind: input, shape index: {}]   ;;  %s308_s4 = inlined_call_operand.<no memory space> [shape: f32[1], index: 4, kind: input, shape index: {}]   ;;  %s309_s5 = inlined_call_operand.hbm [shape: f32[2,16], index: 5, kind: output, shape index: {}]  }
   0x1   :  { %v24_v0 = vld [vmem:[%s306_s2] sm:$0xff]  ;;  %v25_v1 = vld [vmem:[%s306_s2 + $0x8] sm:$0xff]  ;;  %v26_v2 = vld [vmem:[%s306_s2 + $0x10] sm:$0xff]  ;;  %203 = vset.pattern.permute.xlu0 %v228_v6 }
   0x2   :  { %v193_v3 = vpack.c.bf16 %v25_v1, %v24_v0  ;;  %v27_v4 = vld [vmem:[%s306_s2 + $0x18] sm:$0xff]  ;;  %v22_v5 = vld [vmem:[%s304_s0] sm:$0xff] }
   0x3   :  { %v197_v7 = vpack.c.bf16 %v27_v4, %v26_v2  ;;  %190 = vmatprep.mubr.msk.f32.mxu0 %vm35_vm0, %v22_v5  ;;  %v119_v8 = vld [vmem:[%s305_s1] sm:$0xff] }
   0x4   :  { %11 = vsyncpa [#allocation4], 0  ;;  %194 = vmatprep.subr.bf16.mxu0 %v193_v3  ;;  %123 = vperm.xlu0 %203, %v119_v8   ;;  %v120_v9 = vld [vmem:[%s305_s1 + $0x8] sm:$0xff]  ;;  %v173_v12 = vld [vmem:[%s307_s3] ss:$0 sm:$0xff]  ;;  %vm133_vm1 = vcmask 130048   ;;  %v149_v34 = vstv %s308_s4 }
   0x5   :  { %196 = vmatpush3.bf16.msra.mxu0 %v193_v3  ;;  %v23_v10 = vld [vmem:[%s304_s0 + $0x8] sm:$0xff]  ;;  %s229_s3 = smov [#allocation3]   ;;  %vm154_vm2 = vcmask 1041409   ;;  %vm157_vm3 = vcmask 123904  }
   0x6   :  { %198 = vmatprep.subr.bf16.mxu0 %v197_v7  ;;  %s165_s10 = sshll.u32 %s229_s3, 4  ;;  %s166_s10 = int_to_ptr.vmem [resolvable:$true] %s165_s10 }
   0x7   :  { %s204_s11 = scalar_lea.vmem %s166_s10, 32  ;;  %p209_p1 = scmp.lt.s32.totalorder %s166_s10, %s166_s10 }
   0x8   :  { %128 = vperm.xlu0 %203, %v120_v9   ;;  %p205_p0 = scmp.ne.s32.totalorder %s166_s10, %s204_s11  ;;  %p210_p2 = scmp.lt.s32.totalorder %s204_s11, %s204_s11 }
   0x9   :  { %200 = vmatpush3.bf16.msra.mxu0 %v197_v7 }
   0xa   :  { %p211_p3 = por %p210_p2, %p209_p1 }
   0xc   :  { %191 = vmatmul.mubr.msk.f32.vlgmr.msra.gmra.mrb[0].mxu0 %vm35_vm0, %v23_v10  ;;  %p212_p4 = pnand %p211_p3, %p205_p0 }
  0x83   :  { %v124_v11 = vpop.permute.xlu0 %123 }
  0x87   :  { %v129_v18 = vpop.permute.xlu0 %128 }
  0xdf   :  { %v192_v13 = vpop.f32.mrb[0].mxu0 }
  0xe0   :  { %v114_v14 = vadd.f32 %v192_v13, %v173_v12  ;;  %v108_v15 = vpop.f32.mrb[1].mxu0 }
  0xe1   :  { %v109_v16 = vadd.f32 %v173_v12, %v108_v15 }
  0xe2   :  { %v118_v17 = vmax.f32 %v114_v14, 0.0 }
  0xe3   :  { %v117_v19 = vmax.f32 %v109_v16, 0.0 }
  0xe4   :  { %v132_v20 = vmul.f32 %v129_v18, %v118_v17 }
  0xe5   :  { %v131_v21 = vmul.f32 %v124_v11, %v117_v19 }
  0xe6   :  { %v141_v22 = vsel %vm133_vm1, %v132_v20, 0.0 }
  0xe7   :  { %v142_v23 = vrot.slane %v141_v22, 4  ;;  %v134_v24 = vsel %vm133_vm1, %v131_v21, 0.0 }
  0xe8   :  { %v135_v25 = vrot.slane %v134_v24, 4 }
  0xe9   :  { %v143_v26 = vadd.f32 %v142_v23, %v141_v22 }
  0xea   :  { %v136_v27 = vadd.f32 %v135_v25, %v134_v24 }
  0xeb   :  { %v144_v28 = vrot.slane %v143_v26, 2 }
  0xec   :  { %v137_v29 = vrot.slane %v136_v27, 2 }
  0xed   :  { %v145_v30 = vadd.f32 %v144_v28, %v143_v26 }
  0xee   :  { %v138_v31 = vadd.f32 %v137_v29, %v136_v27 }
  0xef   :  { %v146_v32 = vrot.slane %v145_v30, 1 }
  0xf0   :  { %v139_v33 = vrot.slane %v138_v31, 1 }
  0xf1   :  { %v147_v35 = vadd.f32 %v146_v32, %v145_v30 }
  0xf2   :  { %v140_v36 = vadd.f32 %v139_v33, %v138_v31 }
  0xf3   :  { %v151_v37 = vadd.f32 %v149_v34, %v147_v35 }
  0xf4   :  { %v150_v38 = vadd.f32 %v149_v34, %v140_v36 }
  0xf6   :  { %v155_v39 = vsel %vm154_vm2, %v151_v37, %v150_v38 }
  0xf7   :  { %158 = vst.msk [vmem:[#allocation3] sm:$0x3] %vm157_vm3, %v155_v39 }
  0xf8   :  { %215 = shalt.err (!%p212_p4)
}
  0xf9   :  { %s216_s13 = scalar_lea.hbm %s309_s5, 32 }
  0xfa   :  { %p217_p5 = scmp.ne.s32.totalorder %s309_s5, %s216_s13  ;;  %p220_p6 = scmp.lt.u32.totalorder %s216_s13, %s309_s5 }
  0xfc   :  { %p222_p7 = pnand %p220_p6, %p217_p5 }
  0xfe   :  { %225 = shalt.err (!%p222_p7)
}
  0xff   :  { %168 = dma.vmem_to_hbm [thread:$0]  %s166_s10, 32, %s309_s5, [#allocation4]  }
 0x100   :  { %226 = dma.done.wait [#allocation4], 32  }
 0x101   :  { %227 = vsyncadd [#allocation4], 4294967264 }
 0x102   :  { %172 = vsyncpa [#allocation4], 1 }

</bundles_post_ra>
